<compile_context>
chip_gen: v5e
topology: v5e:2x2
jax: 0.10.0
libtpu: 0.0.40
codegen_flags: <defaults>
</compile_context>

<pallas_src>
import functools

import jax
import jax.numpy as jnp
from jax.experimental import pallas as pl
from jax.experimental.pallas import tpu as pltpu


def _round_up(v, m):
    return (v + m - 1) // m * m


def _fused_conv_kernel(x_ref, w_ref, b_ref, o_ref, *, k_max, l_out_pad, nb):
    # x_ref: (NB, C_in, L_x_pad) bf16     w_ref: (C_pad, K_max*C_in) bf16
    # b_ref: (C_pad, 1) f32               o_ref: (NB, C_pad, L_out_pad) f32
    w = w_ref[...]
    bias = b_ref[...]
    for n in range(nb):                       # small static unroll over the batch tile
        # Build the im2col slab in f32 (robust concat path), cast to bf16 for the MXU.
        xn = x_ref[n].astype(jnp.float32)     # (C_in, L_x_pad)
        # slab row k*C_in + c, column t  ==  x[c, t + k]
        slab = jnp.concatenate(
            [xn[:, k:k + l_out_pad] for k in range(k_max)], axis=0)
        acc = jnp.dot(w, slab.astype(jnp.bfloat16),
                      preferred_element_type=jnp.float32) + bias
        o_ref[n] = jnp.maximum(acc, 0.0).astype(o_ref.dtype)


@jax.jit
def conv1d_pool_forward(x, params):
    """Equivalent of Conv1d_pool.forward: [relu(conv1d(x, w_f) + b_f) for each filter]."""
    n, c_in, length = x.shape
    c_out = params[0][0].shape[0]
    filter_sizes = [int(w.shape[2]) for (w, _) in params]
    k_max = max(filter_sizes)
    n_filt = len(params)

    # ---- pack every filter's weights into one (C_pad, K_max*C_in) matrix ----
    c_tot = n_filt * c_out
    c_pad = _round_up(c_tot, 8)
    w_rows, b_rows = [], []
    for (w_f, b_f) in params:
        fs = w_f.shape[2]
        # desired layout: [o, k*C_in + c] = w_f[o, c, k]
        wf = jnp.transpose(w_f, (0, 2, 1)).reshape(c_out, fs * c_in)
        wf = jnp.pad(wf, ((0, 0), (0, (k_max - fs) * c_in)))   # zero taps k >= fs
        w_rows.append(wf)
        b_rows.append(b_f.reshape(c_out, 1))
    if c_pad > c_tot:
        w_rows.append(jnp.zeros((c_pad - c_tot, k_max * c_in), jnp.float32))
        b_rows.append(jnp.zeros((c_pad - c_tot, 1), jnp.float32))
    w_all = jnp.concatenate(w_rows, axis=0).astype(jnp.bfloat16)
    b_all = jnp.concatenate(b_rows, axis=0).astype(jnp.float32)

    # ---- pad x: lane-dense output width + (K_max-1) halo; tile the batch ----
    l_out_pad = _round_up(length - min(filter_sizes) + 1, 128)
    l_x_pad = l_out_pad + k_max - 1
    nb = n if n <= 8 else 8
    n_pad = _round_up(n, nb)
    x_pad = jnp.pad(x, ((0, n_pad - n), (0, 0), (0, l_x_pad - length)))
    x_pad = x_pad.astype(jnp.bfloat16)

    kernel = functools.partial(_fused_conv_kernel,
                               k_max=k_max, l_out_pad=l_out_pad, nb=nb)
    out_full = pl.pallas_call(
        kernel,
        out_shape=jax.ShapeDtypeStruct((n_pad, c_pad, l_out_pad), jnp.float32),
        grid_spec=pltpu.PrefetchScalarGridSpec(
            num_scalar_prefetch=0,
            grid=(n_pad // nb,),
            in_specs=[
                pl.BlockSpec((nb, c_in, l_x_pad), lambda i: (i, 0, 0)),
                pl.BlockSpec((c_pad, k_max * c_in), lambda i: (0, 0)),
                pl.BlockSpec((c_pad, 1), lambda i: (0, 0)),
            ],
            out_specs=pl.BlockSpec((nb, c_pad, l_out_pad), lambda i: (i, 0, 0)),
        ),
        compiler_params=pltpu.CompilerParams(
            dimension_semantics=("parallel",),
        ),
    )(x_pad, w_all, b_all)

    # ---- slice off batch / channel / length padding, one output per filter ----
    outs = []
    for f, fs in enumerate(filter_sizes):
        outs.append(out_full[:n, f * c_out:(f + 1) * c_out, :length - fs + 1])
    return outs


def init_conv_params(key, in_channels, out_channels, kernel_size):
    """Xavier-uniform weight (PyTorch convention), constant 0.1 bias."""
    fan_in = in_channels * kernel_size
    fan_out = out_channels * kernel_size
    bound = (6.0 / (fan_in + fan_out)) ** 0.5
    w = jax.random.uniform(
        key, (out_channels, in_channels, kernel_size),
        minval=-bound, maxval=bound, dtype=jnp.float32)
    b = jnp.full((out_channels,), 0.1, dtype=jnp.float32)
    return w, b


if __name__ == "__main__":
    key = jax.random.PRNGKey(0)
    batch, in_channels, out_channels, length = 2, 4, 8, 16
    filter_sizes = [2, 3, 4]

    k_x, *k_ws = jax.random.split(key, 1 + len(filter_sizes))
    x = jax.random.normal(k_x, (batch, in_channels, length), dtype=jnp.float32)
    params = [
        init_conv_params(kw, in_channels, out_channels, fs)
        for kw, fs in zip(k_ws, filter_sizes)
    ]

    outs = conv1d_pool_forward(x, params)
    for o in outs:
        jax.block_until_ready(o)

    # sanity check: the kernel feeds bf16 operands to the MXU (f32 accumulation),
    # so compare against a reference built from the same bf16-cast operands.
    x_bf = x.astype(jnp.bfloat16).astype(jnp.float32)
    for (w, b), fs, o in zip(params, filter_sizes, outs):
        w_bf = w.astype(jnp.bfloat16).astype(jnp.float32)
        ref = jax.lax.conv_general_dilated(
            x_bf, w_bf, window_strides=(1,), padding="VALID",
            dimension_numbers=("NCH", "OIH", "NCH"))
        ref = jnp.maximum(ref + b.reshape(1, -1, 1), 0.0)
        assert o.shape == (batch, out_channels, length - fs + 1)
        assert jnp.allclose(o, ref, atol=1e-3, rtol=1e-3), f"mismatch for filter size {fs}"

    print("KERNEL_OK")
</pallas_src>

<mosaic_0001>
module attributes {stable_mosaic.version = 11 : i64} {
  func.func @_fused_conv_kernel(%arg0: i32, %arg1: memref<2x4x131xbf16, #tpu.memory_space<vmem>>, %arg2: memref<24x16xbf16, #tpu.memory_space<vmem>>, %arg3: memref<24x1xf32, #tpu.memory_space<vmem>>, %arg4: memref<2x24x128xf32, #tpu.memory_space<vmem>>) attributes {dimension_semantics = [#tpu.dimension_semantics<parallel>], iteration_bounds = array<i64: 1>, scalar_prefetch = 0 : i64, scratch_operands = 0 : i64, tpu.core_type = #tpu.core_type<tc>, window_params = [{transform_indices = @transform_0, window_bounds = array<i64: 2, 4, 131>}, {pipeline_mode = #tpu.pipeline_mode<synchronous>, transform_indices = @transform_1, window_bounds = array<i64: 24, 16>}, {pipeline_mode = #tpu.pipeline_mode<synchronous>, transform_indices = @transform_2, window_bounds = array<i64: 24, 1>}, {transform_indices = @transform_3, window_bounds = array<i64: 2, 24, 128>}]} {
    %c0 = arith.constant 0 : index
    %c0_0 = arith.constant 0 : index
    %0 = vector.load %arg2[%c0, %c0_0] : memref<24x16xbf16, #tpu.memory_space<vmem>>, vector<24x16xbf16>
    %c0_1 = arith.constant 0 : index
    %c0_2 = arith.constant 0 : index
    %1 = vector.load %arg3[%c0_1, %c0_2] : memref<24x1xf32, #tpu.memory_space<vmem>>, vector<24x1xf32>
    %c0_3 = arith.constant 0 : index
    %c0_4 = arith.constant 0 : index
    %c0_5 = arith.constant 0 : index
    %2 = vector.load %arg1[%c0_3, %c0_4, %c0_5] : memref<2x4x131xbf16, #tpu.memory_space<vmem>>, vector<1x4x131xbf16>
    %3 = vector.shape_cast %2 : vector<1x4x131xbf16> to vector<4x131xbf16>
    %4 = arith.extf %3 : vector<4x131xbf16> to vector<4x131xf32>
    %5 = vector.extract_strided_slice %4 {offsets = [0, 0], sizes = [4, 128], strides = [1, 1]} : vector<4x131xf32> to vector<4x128xf32>
    %6 = vector.extract_strided_slice %4 {offsets = [0, 1], sizes = [4, 128], strides = [1, 1]} : vector<4x131xf32> to vector<4x128xf32>
    %7 = vector.extract_strided_slice %4 {offsets = [0, 2], sizes = [4, 128], strides = [1, 1]} : vector<4x131xf32> to vector<4x128xf32>
    %8 = vector.extract_strided_slice %4 {offsets = [0, 3], sizes = [4, 128], strides = [1, 1]} : vector<4x131xf32> to vector<4x128xf32>
    %9 = tpu.concatenate %5, %6, %7, %8 in 0 : vector<4x128xf32>, vector<4x128xf32>, vector<4x128xf32>, vector<4x128xf32> -> vector<16x128xf32>
    %10 = arith.truncf %9 : vector<16x128xf32> to vector<16x128xbf16>
    %cst = arith.constant dense<0.000000e+00> : vector<24x128xf32>
    %11 = tpu.matmul %0, %10, %cst {dimension_numbers = #tpu.dot_dimension_numbers<[1], [0], [0], [1], [0, 0, 1, 1], [], []>} : vector<24x16xbf16>, vector<16x128xbf16>, vector<24x128xf32> -> vector<24x128xf32>
    %12 = vector.broadcast %1 : vector<24x1xf32> to vector<24x128xf32>
    %13 = arith.addf %11, %12 : vector<24x128xf32>
    %cst_6 = arith.constant 0.000000e+00 : f32
    %14 = vector.broadcast %cst_6 : f32 to vector<24x128xf32>
    %15 = arith.maximumf %13, %14 : vector<24x128xf32>
    %c0_7 = arith.constant 0 : index
    %c0_8 = arith.constant 0 : index
    %c0_9 = arith.constant 0 : index
    %16 = vector.load %arg4[%c0_7, %c0_8, %c0_9] : memref<2x24x128xf32, #tpu.memory_space<vmem>>, vector<1x24x128xf32>
    %17 = vector.shape_cast %16 : vector<1x24x128xf32> to vector<24x128xf32>
    %18 = vector.shape_cast %15 : vector<24x128xf32> to vector<1x24x128xf32>
    tpu.vector_store %arg4[%c0_7, %c0_8, %c0_9], %18 {strides = array<i32>} : memref<2x24x128xf32, #tpu.memory_space<vmem>>, vector<1x24x128xf32>,
    %c1 = arith.constant 1 : index
    %c0_10 = arith.constant 0 : index
    %c0_11 = arith.constant 0 : index
    %19 = vector.load %arg1[%c1, %c0_10, %c0_11] : memref<2x4x131xbf16, #tpu.memory_space<vmem>>, vector<1x4x131xbf16>
    %20 = vector.shape_cast %19 : vector<1x4x131xbf16> to vector<4x131xbf16>
    %21 = arith.extf %20 : vector<4x131xbf16> to vector<4x131xf32>
    %22 = vector.extract_strided_slice %21 {offsets = [0, 0], sizes = [4, 128], strides = [1, 1]} : vector<4x131xf32> to vector<4x128xf32>
    %23 = vector.extract_strided_slice %21 {offsets = [0, 1], sizes = [4, 128], strides = [1, 1]} : vector<4x131xf32> to vector<4x128xf32>
    %24 = vector.extract_strided_slice %21 {offsets = [0, 2], sizes = [4, 128], strides = [1, 1]} : vector<4x131xf32> to vector<4x128xf32>
    %25 = vector.extract_strided_slice %21 {offsets = [0, 3], sizes = [4, 128], strides = [1, 1]} : vector<4x131xf32> to vector<4x128xf32>
    %26 = tpu.concatenate %22, %23, %24, %25 in 0 : vector<4x128xf32>, vector<4x128xf32>, vector<4x128xf32>, vector<4x128xf32> -> vector<16x128xf32>
    %27 = arith.truncf %26 : vector<16x128xf32> to vector<16x128xbf16>
    %cst_12 = arith.constant dense<0.000000e+00> : vector<24x128xf32>
    %28 = tpu.matmul %0, %27, %cst_12 {dimension_numbers = #tpu.dot_dimension_numbers<[1], [0], [0], [1], [0, 0, 1, 1], [], []>} : vector<24x16xbf16>, vector<16x128xbf16>, vector<24x128xf32> -> vector<24x128xf32>
    %29 = vector.broadcast %1 : vector<24x1xf32> to vector<24x128xf32>
    %30 = arith.addf %28, %29 : vector<24x128xf32>
    %cst_13 = arith.constant 0.000000e+00 : f32
    %31 = vector.broadcast %cst_13 : f32 to vector<24x128xf32>
    %32 = arith.maximumf %30, %31 : vector<24x128xf32>
    %c1_14 = arith.constant 1 : index
    %c0_15 = arith.constant 0 : index
    %c0_16 = arith.constant 0 : index
    %33 = vector.load %arg4[%c1_14, %c0_15, %c0_16] : memref<2x24x128xf32, #tpu.memory_space<vmem>>, vector<1x24x128xf32>
    %34 = vector.shape_cast %33 : vector<1x24x128xf32> to vector<24x128xf32>
    %35 = vector.shape_cast %32 : vector<24x128xf32> to vector<1x24x128xf32>
    tpu.vector_store %arg4[%c1_14, %c0_15, %c0_16], %35 {strides = array<i32>} : memref<2x24x128xf32, #tpu.memory_space<vmem>>, vector<1x24x128xf32>,
    return
  }
  func.func @transform_0(%arg0: i32) -> (i32, i32, i32) {
    %c0_i32 = arith.constant 0 : i32
    %c0_i32_0 = arith.constant 0 : i32
    %c0_i32_1 = arith.constant 0 : i32
    return %arg0, %c0_i32, %c0_i32_0 : i32, i32, i32
  }
  func.func @transform_1(%arg0: i32) -> (i32, i32) {
    %c0_i32 = arith.constant 0 : i32
    %c0_i32_0 = arith.constant 0 : i32
    %c0_i32_1 = arith.constant 0 : i32
    return %c0_i32, %c0_i32_0 : i32, i32
  }
  func.func @transform_2(%arg0: i32) -> (i32, i32) {
    %c0_i32 = arith.constant 0 : i32
    %c0_i32_0 = arith.constant 0 : i32
    %c0_i32_1 = arith.constant 0 : i32
    return %c0_i32, %c0_i32_0 : i32, i32
  }
  func.func @transform_3(%arg0: i32) -> (i32, i32, i32) {
    %c0_i32 = arith.constant 0 : i32
    %c0_i32_0 = arith.constant 0 : i32
    %c0_i32_1 = arith.constant 0 : i32
    return %arg0, %c0_i32, %c0_i32_0 : i32, i32, i32
  }
}

</mosaic_0001>

<bundles_post_ra>
// kernel: conv1d_pool_forward.1
= control target key start
LH: loop header
LB: loop body
LE: loop exit
PB: predicated region body
PF: predicated region fallthrough
CT: control target
= control target key end

     0   :  { %s231_s14 = smov 127   ;;  %s232_s15 = smov 126   ;;  %v234_v24 = vmov 0   ;;  %vm32_vm0 = vcmask 1039360   ;;  %vm42_vm1 = vcmask 1031168   ;;  %vm56_vm2 = vcmask 1043456   ;;  %s313_s0 = inlined_call_operand.vmem [shape: bf16[2,4,131], index: 0, kind: input, shape index: {}]   ;;  %s314_s2 = inlined_call_operand.vmem [shape: f32[24,1], index: 2, kind: input, shape index: {}]   ;;  %s315_s1 = inlined_call_operand.vmem [shape: bf16[24,16], index: 1, kind: input, shape index: {}]   ;;  %s316_s3 = inlined_call_operand.vmem [shape: f32[2,24,128], index: 3, kind: output, shape index: {}]  }
   0x1   :  { %v21_v0 = vld [vmem:[%s313_s0] sm:$0xff]   ;;  %s233_s0 = smov 125   ;;  %v19_v23 = vld [vmem:[%s314_s2 + $0x8] sm:$0xff]  ;;  %229 = vset.pattern.permute.xlu1 %v234_v24  ;;  %228 = vset.pattern.permute.xlu0 %v234_v24  ;;  %v20_v25 = vld [vmem:[%s314_s2 + $0x10] sm:$0xff]  ;;  %vm53_vm3 = vcmask 1022976   ;;  %vm83_vm4 = vcmask 130048  }
   0x2   :  { %v258_v1 = vunpack.c.l.bf16 %v21_v0  ;;  %v263_v8 = vunpack.c.h.bf16 %v21_v0  ;;  %v18_v22 = vld [vmem:[%s314_s2] sm:$0xff]  ;;  %230 = vset.pattern.permute.xlu2 %v234_v24  ;;  %v17_v33 = vld [vmem:[%s315_s1 + $0x8] sm:$0xf] }
   0x3   :  { %v80_v40 = vunpack.c.l.b16 %v17_v33  ;;  %v191_v49 = vld [vmem:[%s315_s1] sm:$0xff] }
   0x4   :  { %25 = vst [vmem:[#allocation1 + $0x1] ss:$2 sm:$0xff] %v258_v1 }
   0x5   :  { %v82_v48 = vpack.c.b16 %v80_v40, %v80_v40 }
   0xb   :  { %v26_v2 = vld.sshfl [vmem:[#allocation1] sm:$0xff pattern:$0x75316420]  ;;  %v27_v3 = vld.sshfl [vmem:[#allocation1 + $0x8] sm:$0xff pattern:$0x75316420] }
   0xc   :  { %v198_v4 = vpack.i.bf16 %v27_v3, %v26_v2  ;;  %35 = vst [vmem:[#allocation1] ss:$2 sm:$0xff] %v258_v1 }
   0xe   :  { %199 = vrot.lane.b32.xlu0 %v198_v4, %s231_s14 }
  0x13   :  { %v36_v5 = vld.sshfl [vmem:[#allocation1] sm:$0xff pattern:$0x75316420]  ;;  %v37_v6 = vld.sshfl [vmem:[#allocation1 + $0x8] sm:$0xff pattern:$0x75316420] }
  0x14   :  { %v203_v7 = vpack.i.bf16 %v37_v6, %v36_v5  ;;  %46 = vst [vmem:[#allocation1 + $0x1] ss:$2 sm:$0xff] %v258_v1 }
  0x16   :  { %204 = vrot.lane.b32.xlu0 %v203_v7, %s232_s15 }
  0x1b   :  { %v47_v9 = vld.sshfl [vmem:[#allocation1] sm:$0xff pattern:$0x75316420]  ;;  %v48_v10 = vld.sshfl [vmem:[#allocation1 + $0x8] sm:$0xff pattern:$0x75316420] }
  0x1c   :  { %v208_v11 = vpack.i.bf16 %v48_v10, %v47_v9  ;;  %119 = vst [vmem:[#allocation1 + $0x1] ss:$2 sm:$0xff] %v263_v8 }
  0x1e   :  { %209 = vrot.lane.b32.xlu1 %v208_v11, %s233_s0  ;;  %62 = vperm.xlu0 %228, %v18_v22  }
  0x23   :  { %v120_v12 = vld.sshfl [vmem:[#allocation1] sm:$0xff pattern:$0x75316420]  ;;  %v121_v13 = vld.sshfl [vmem:[#allocation1 + $0x8] sm:$0xff pattern:$0x75316420] }
  0x24   :  { %v213_v14 = vpack.i.bf16 %v121_v13, %v120_v12  ;;  %128 = vst [vmem:[#allocation1] ss:$2 sm:$0xff] %v263_v8 }
  0x26   :  { %214 = vrot.lane.b32.xlu1 %v213_v14, %s231_s14 }
  0x2b   :  { %v129_v15 = vld.sshfl [vmem:[#allocation1] sm:$0xff pattern:$0x75316420]  ;;  %v130_v16 = vld.sshfl [vmem:[#allocation1 + $0x8] sm:$0xff pattern:$0x75316420] }
  0x2c   :  { %v218_v17 = vpack.i.bf16 %v130_v16, %v129_v15  ;;  %138 = vst [vmem:[#allocation1 + $0x1] ss:$2 sm:$0xff] %v263_v8 }
  0x2e   :  { %219 = vrot.lane.b32.xlu2 %v218_v17, %s232_s15  ;;  %67 = vperm.xlu1 %229, %v19_v23  }
  0x33   :  { %v139_v18 = vld.sshfl [vmem:[#allocation1] sm:$0xff pattern:$0x75316420]  ;;  %v140_v19 = vld.sshfl [vmem:[#allocation1 + $0x8] sm:$0xff pattern:$0x75316420] }
  0x34   :  { %v223_v20 = vpack.i.bf16 %v140_v19, %v139_v18 }
  0x36   :  { %224 = vrot.lane.b32.xlu2 %v223_v20, %s233_s0 }
  0x3e   :  { %72 = vperm.xlu2 %230, %v20_v25  }
  0x80   :  { %v200_v21 = vpop.permute.xlu0 %199 }
  0x81   :  { %v202_v28 = vunpack.i.h.bf16 %v200_v21  ;;  %v201_v29 = vunpack.i.l.bf16 %v200_v21 }
  0x83   :  { %v33_v32 = vsel %vm32_vm0, %v201_v29, %v202_v28 }
  0x84   :  { %v57_v39 = vsel %vm56_vm2, %v258_v1, %v33_v32 }
  0x88   :  { %v220_v26 = vpop.permute.xlu2 %219  ;;  %v205_v27 = vpop.permute.xlu0 %204 }
  0x89   :  { %v207_v30 = vunpack.i.h.bf16 %v205_v27  ;;  %v206_v31 = vunpack.i.l.bf16 %v205_v27  ;;  %v222_v42 = vunpack.i.h.bf16 %v220_v26  ;;  %v221_v44 = vunpack.i.l.bf16 %v220_v26 }
  0x8b   :  { %v43_v37 = vsel %vm42_vm1, %v206_v31, %v207_v30  ;;  %v135_v53 = vsel %vm42_vm1, %v221_v44, %v222_v42 }
  0x90   :  { %v210_v34 = vpop.permute.xlu1 %209  ;;  %v225_v38 = vpop.permute.xlu2 %224 }
  0x91   :  { %v212_v35 = vunpack.i.h.bf16 %v210_v34  ;;  %v211_v36 = vunpack.i.l.bf16 %v210_v34  ;;  %v227_v45 = vunpack.i.h.bf16 %v225_v38  ;;  %v226_v46 = vunpack.i.l.bf16 %v225_v38  ;;  %v63_v59 = vpop.permute.xlu0 %62 }
  0x93   :  { %v54_v41 = vsel %vm53_vm3, %v211_v36, %v212_v35  ;;  %v145_v54 = vsel %vm53_vm3, %v226_v46, %v227_v45 }
  0x94   :  { %v58_v43 = vsel %vm56_vm2, %v43_v37, %v54_v41  ;;  %v148_v57 = vsel %vm56_vm2, %v135_v53, %v145_v54 }
  0x95   :  { %v59_v47 = vpack.c.bf16 %v58_v43, %v57_v39 }
  0x97   :  { %97 = vmatpush.bf16.msra.mxu0 %v59_v47  ;;  %192 = vmatpush.bf16.msra.mxu2 %v59_v47 }
  0x98   :  { %v215_v50 = vpop.permute.xlu1 %214  ;;  %v73_v63 = vpop.permute.xlu2 %72 }
  0x99   :  { %v217_v51 = vunpack.i.h.bf16 %v215_v50  ;;  %v216_v52 = vunpack.i.l.bf16 %v215_v50 }
  0x9a   :  { %184 = vmatmul.msk.bf16.vlgmr.msra.gmra.mxu2 %vm83_vm4, %v82_v48  ;;  %183 = vmatmul.msk.bf16.vlgmr.msra.gmra.mxu0 %vm83_vm4, %v191_v49 }
  0x9b   :  { %v126_v55 = vsel %vm32_vm0, %v216_v52, %v217_v51 }
  0x9c   :  { %v147_v56 = vsel %vm56_vm2, %v263_v8, %v126_v55 }
  0x9d   :  { %v149_v58 = vpack.c.bf16 %v148_v57, %v147_v56 }
  0x9f   :  { %157 = vmatpush.bf16.msra.mxu1 %v149_v58  ;;  %193 = vmatpush.bf16.msra.mxu3 %v149_v58 }
  0xa0   :  { %v68_v1 = vpop.permute.xlu1 %67 }
  0xa2   :  { %186 = vmatmul.msk.bf16.vlgmr.msra.gmra.mxu1 %vm83_vm4, %v191_v49  ;;  %187 = vmatmul.msk.bf16.vlgmr.msra.gmra.mxu3 %vm83_vm4, %v82_v48 }
 0x117   :  { %v99_v60 = vpop.f32.mrf.mxu0 }
 0x118   :  { %v100_v61 = vadd.f32 %v99_v60, %v63_v59 }
 0x11a   :  { %v108_v62 = vmax.f32 %v100_v61, 0.0 }
 0x11c   :  { %111 = vst [vmem:[%s316_s3] sm:$0xff] %v108_v62 }
 0x11d   :  { %v104_v0 = vpop.f32.mrf.mxu2 }
 0x11e   :  { %v105_v2 = vadd.f32 %v104_v0, %v73_v63 }
 0x11f   :  { %v159_v3 = vpop.f32.mrf.mxu1  ;;  %v101_v4 = vpop.f32.mrf.mxu0 }
 0x120   :  { %v160_v5 = vadd.f32 %v159_v3, %v63_v59  ;;  %v102_v6 = vadd.f32 %v101_v4, %v68_v1  ;;  %v110_v7 = vmax.f32 %v105_v2, 0.0 }
 0x122   :  { %v168_v8 = vmax.f32 %v160_v5, 0.0  ;;  %v109_v9 = vmax.f32 %v102_v6, 0.0  ;;  %113 = vst [vmem:[%s316_s3 + $0x10] sm:$0xff] %v110_v7 }
 0x124   :  { %188 = vst [vmem:[%s316_s3 + $0x18] sm:$0xff] %v168_v8 }
 0x125   :  { %112 = vst [vmem:[%s316_s3 + $0x8] sm:$0xff] %v109_v9  ;;  %v106_v10 = vpop.f32.mrf.mxu2  ;;  %v164_v11 = vpop.f32.mrf.mxu3 }
 0x126   :  { %v165_v12 = vadd.f32 %v164_v11, %v73_v63 }
 0x127   :  { %v161_v13 = vpop.f32.mrf.mxu1 }
 0x128   :  { %v170_v14 = vmax.f32 %v165_v12, 0.0  ;;  %v162_v15 = vadd.f32 %v161_v13, %v68_v1 }
 0x12a   :  { %190 = vst [vmem:[%s316_s3 + $0x28] sm:$0xff] %v170_v14  ;;  %v169_v16 = vmax.f32 %v162_v15, 0.0 }
 0x12c   :  { %189 = vst [vmem:[%s316_s3 + $0x20] sm:$0xff] %v169_v16 }
 0x12d   :  { %v166_v17 = vpop.f32.mrf.mxu3 }

</bundles_post_ra>
